<compile_context>
chip_gen: v7x
topology: tpu7x:2x2x1
jax: 0.10.0
libtpu: 0.0.40
codegen_flags: <defaults>
</compile_context>

<pallas_src>
import math

import jax
import jax.numpy as jnp
import numpy as np
from jax.experimental import pallas as pl
from jax.experimental.pallas import tpu as pltpu


def _round_up(n, m):
    return ((n + m - 1) // m) * m


def _sublane_quantum(dtype):
    itemsize = jnp.dtype(dtype).itemsize
    if itemsize >= 4:
        return 8
    if itemsize == 2:
        return 16
    return 32


def _choose_tile_l(L, max_tile, quantum):
    max_tile = max(quantum, (max_tile // quantum) * quantum)
    if L <= max_tile:
        return _round_up(L, quantum)          # single (possibly padded) tile
    t = max_tile
    while t >= quantum:
        if L % t == 0:
            return t
        t -= quantum
    # No quantum-aligned divisor of L <= max_tile: pad L up to a multiple of max_tile
    # in the wrapper (bounded tile size, no VMEM blowup).
    return max_tile


def _choose_tile_d(d_model, max_tile):
    # Full-extent last dim is always a legal block; only split when d_model is a
    # multiple of 128 (keeps stores lane-dense without any pad/crop round trip).
    if d_model <= max_tile or d_model % 128 != 0:
        return d_model
    t = (max_tile // 128) * 128
    while t >= 128:
        if d_model % t == 0:
            return t
        t -= 128
    return d_model


def _token_embed_kernel(x3_ref, w_ref, o_ref):
    # x3_ref: (TILE_L, 3*C_in)  pre-unfolded rows [x[t-1] | x[t] | x[t+1]]
    # w_ref:  (3*C_in, TILE_D)  packed taps [W0; W1; W2]
    # o_ref:  (TILE_L, TILE_D)
    o_ref[...] = jnp.dot(
        x3_ref[...], w_ref[...], preferred_element_type=jnp.float32
    ).astype(o_ref.dtype)


def token_embedding(x, weight, *, tile_l_max=1024, tile_d_max=512):
    """x: (B, L, C_in); weight: (d_model, C_in, 3) [PyTorch Conv1d layout].

    Returns (B, L, d_model), matching TokenEmbedding.forward.
    """
    B, L, c_in = x.shape
    d_model = weight.shape[0]
    dtype = x.dtype
    k3 = 3 * c_in

    # Packed taps in the activation dtype: rows [W0; W1; W2] with Wk = weight[:,:,k].T.
    w_packed = jnp.transpose(weight, (2, 1, 0)).reshape(k3, d_model).astype(dtype)

    # Wrapper-side circular unfold (cheap: 3x a tiny (B, L, C_in) array).
    x_prev = jnp.roll(x, 1, axis=1)
    x_next = jnp.roll(x, -1, axis=1)
    x3 = jnp.concatenate([x_prev, x, x_next], axis=-1)               # (B, L, 3*C_in)

    quantum = _sublane_quantum(dtype)
    tile_l = _choose_tile_l(L, tile_l_max, quantum)
    tile_d = _choose_tile_d(d_model, tile_d_max)

    L_pad = _round_up(L, tile_l)
    if L_pad != L:
        x3 = jnp.pad(x3, ((0, 0), (0, L_pad - L), (0, 0)))
    n_l = L_pad // tile_l
    n_d = d_model // tile_d

    # VMEM budget derived from the tile sizes (double-buffered operands + f32 acc temp).
    itemsize = jnp.dtype(dtype).itemsize
    per_step = (2 * tile_l * k3 * itemsize
                + 2 * k3 * tile_d * itemsize
                + 2 * tile_l * tile_d * itemsize
                + tile_l * tile_d * 4)
    vmem_limit = int(min(max(4 * per_step, 32 << 20), 40 << 20))

    out = pl.pallas_call(
        _token_embed_kernel,
        out_shape=jax.ShapeDtypeStruct((B, L_pad, d_model), dtype),
        grid_spec=pltpu.PrefetchScalarGridSpec(
            num_scalar_prefetch=0,
            # Sequence axis innermost -> weight block index constant over the inner
            # axis, so the packed weights are not re-DMAed every step.
            grid=(B, n_d, n_l),
            in_specs=[
                pl.BlockSpec((pl.Squeezed(), tile_l, k3),
                             lambda b, d, l: (b, l, 0)),
                pl.BlockSpec((k3, tile_d),
                             lambda b, d, l: (0, d)),
            ],
            out_specs=pl.BlockSpec((pl.Squeezed(), tile_l, tile_d),
                                   lambda b, d, l: (b, l, d)),
        ),
        compiler_params=pltpu.CompilerParams(
            dimension_semantics=("parallel", "parallel", "parallel"),
            vmem_limit_bytes=vmem_limit,
        ),
    )(x3, w_packed)

    return out if L_pad == L else out[:, :L, :]


def _reference(x, weight):
    # Pure-JAX reference of the circular conv1d (for correctness check).
    x_prev = jnp.roll(x, 1, axis=1)
    x_next = jnp.roll(x, -1, axis=1)
    w0 = weight[:, :, 0].T
    w1 = weight[:, :, 1].T
    w2 = weight[:, :, 2].T
    return x_prev @ w0 + x @ w1 + x_next @ w2


if __name__ == "__main__":
    def make_inputs(key, B, L, c_in, d_model, dtype=jnp.float32):
        kx, kw = jax.random.split(key)
        # Kaiming-normal (fan_in, leaky_relu slope 0.01) init, matching the PyTorch module.
        fan_in = c_in * 3
        gain = math.sqrt(2.0 / (1.0 + 0.01 ** 2))
        std = gain / math.sqrt(fan_in)
        weight = std * jax.random.normal(kw, (d_model, c_in, 3), dtype=dtype)
        x = jax.random.normal(kx, (B, L, c_in), dtype=dtype)
        return x, weight

    key = jax.random.PRNGKey(0)

    # Small shapes consistent with the module: B=2, L=16, c_in=4, d_model=32.
    x, weight = make_inputs(key, 2, 16, 4, 32)
    ref = _reference(x, weight)

    out = jax.block_until_ready(token_embedding(x, weight))
    np.testing.assert_allclose(np.asarray(out), np.asarray(ref), rtol=1e-5, atol=1e-5)

    # Force multiple sequence tiles (exercises the tiled-L path of the packed unfold).
    out_tiled = jax.block_until_ready(
        token_embedding(x, weight, tile_l_max=8, tile_d_max=128))
    np.testing.assert_allclose(np.asarray(out_tiled), np.asarray(ref), rtol=1e-5, atol=1e-5)

    # d_model multiple of 128 with n_d > 1 (exercises d-tiling with weight reuse
    # over the inner sequence axis).
    x2, w2 = make_inputs(jax.random.PRNGKey(0), 2, 32, 4, 256)
    ref2 = _reference(x2, w2)
    out2 = jax.block_until_ready(
        token_embedding(x2, w2, tile_l_max=16, tile_d_max=128))
    np.testing.assert_allclose(np.asarray(out2), np.asarray(ref2), rtol=1e-5, atol=1e-5)

    print("KERNEL_OK")
</pallas_src>

<mosaic_0001>
module attributes {stable_mosaic.version = 11 : i64} {
  func.func @_token_embed_kernel(%arg0: i32, %arg1: i32, %arg2: i32, %arg3: memref<1x16x12xf32, #tpu.memory_space<vmem>>, %arg4: memref<12x32xf32, #tpu.memory_space<vmem>>, %arg5: memref<1x16x32xf32, #tpu.memory_space<vmem>>) attributes {dimension_semantics = [#tpu.dimension_semantics<parallel>, #tpu.dimension_semantics<parallel>, #tpu.dimension_semantics<parallel>], iteration_bounds = array<i64: 2, 1, 1>, scalar_prefetch = 0 : i64, scratch_operands = 0 : i64, tpu.core_type = #tpu.core_type<tc>, window_params = [{transform_indices = @transform_0, window_bounds = array<i64: 1, 16, 12>}, {transform_indices = @transform_1, window_bounds = array<i64: 12, 32>}, {transform_indices = @transform_2, window_bounds = array<i64: 1, 16, 32>}]} {
    %c0 = arith.constant 0 : index
    %c0_0 = arith.constant 0 : index
    %c0_1 = arith.constant 0 : index
    %0 = vector.load %arg3[%c0, %c0_0, %c0_1] : memref<1x16x12xf32, #tpu.memory_space<vmem>>, vector<1x16x12xf32>
    %1 = vector.shape_cast %0 : vector<1x16x12xf32> to vector<16x12xf32>
    %c0_2 = arith.constant 0 : index
    %c0_3 = arith.constant 0 : index
    %2 = vector.load %arg4[%c0_2, %c0_3] : memref<12x32xf32, #tpu.memory_space<vmem>>, vector<12x32xf32>
    %cst = arith.constant dense<0.000000e+00> : vector<16x32xf32>
    %3 = tpu.matmul %1, %2, %cst {dimension_numbers = #tpu.dot_dimension_numbers<[1], [0], [0], [1], [0, 0, 1, 1], [], []>} : vector<16x12xf32>, vector<12x32xf32>, vector<16x32xf32> -> vector<16x32xf32>
    %c0_4 = arith.constant 0 : index
    %c0_5 = arith.constant 0 : index
    %c0_6 = arith.constant 0 : index
    %4 = vector.load %arg5[%c0_4, %c0_5, %c0_6] : memref<1x16x32xf32, #tpu.memory_space<vmem>>, vector<1x16x32xf32>
    %5 = vector.shape_cast %4 : vector<1x16x32xf32> to vector<16x32xf32>
    %6 = vector.shape_cast %3 : vector<16x32xf32> to vector<1x16x32xf32>
    tpu.vector_store %arg5[%c0_4, %c0_5, %c0_6], %6 {strides = array<i32>} : memref<1x16x32xf32, #tpu.memory_space<vmem>>, vector<1x16x32xf32>,
    return
  }
  func.func @transform_0(%arg0: i32, %arg1: i32, %arg2: i32) -> (i32, i32, i32) {
    %c0_i32 = arith.constant 0 : i32
    %c0_i32_0 = arith.constant 0 : i32
    return %arg0, %arg2, %c0_i32 : i32, i32, i32
  }
  func.func @transform_1(%arg0: i32, %arg1: i32, %arg2: i32) -> (i32, i32) {
    %c0_i32 = arith.constant 0 : i32
    %c0_i32_0 = arith.constant 0 : i32
    return %c0_i32, %arg1 : i32, i32
  }
  func.func @transform_2(%arg0: i32, %arg1: i32, %arg2: i32) -> (i32, i32, i32) {
    %c0_i32 = arith.constant 0 : i32
    return %arg0, %arg2, %arg1 : i32, i32, i32
  }
}

</mosaic_0001>

<bundles_post_ra>
// kernel: tpu_custom_call.1
= control target key start
LH: loop header
LB: loop body
LE: loop exit
PB: predicated region body
PF: predicated region fallthrough
CT: control target
= control target key end

     0   :  { %7 = vsyncpa [#allocation3], 0  ;;  %s721_s0 = inlined_call_operand.vmem [shape: f32[2,16,12], index: 0, kind: input, shape index: {}]   ;;  %s722_s1 = inlined_call_operand.vmem [shape: f32[12,32], index: 1, kind: input, shape index: {}]   ;;  %s723_s2 = inlined_call_operand.hbm [shape: f32[2,16,32], index: 2, kind: output, shape index: {}]  }
   0x1   :  { %9 = vsyncpa [#allocation3 + $0x1], 0  ;;  %s600_s9 = smov 0   ;;  %s602_s10 = smov 0  }
   0x2   :  { %s604_s11 = smov 0   ;;  %s606_s12 = smov 0  }
   0x3   :  { %s608_s13 = smov 0   ;;  %s610_s14 = smov 0  }
   0x4 LB: > { %s407_s15 = sadd.s32 4294967295, %s579_s14   ;;  %s408_s16 = sadd.s32 4294967294, %s579_s14   ;;  %s579_s14 = sphi %s610_s14, %s15_s14   ;;  %s575_s13 = sphi %s608_s13, %s730_s13   ;;  %s571_s12 = sphi %s606_s12, %s729_s12   ;;  %s567_s11 = sphi %s604_s11, %s728_s11   ;;  %s563_s10 = sphi %s602_s10, %s727_s10   ;;  %s559_s9 = sphi %s600_s9, %s726_s9  }
   0x5   : > { %s34_s17 = sadd.s32 1, %s575_s13  ;;  %s99_s18 = sadd.s32 1, %s567_s11 }
   0x6   : > { %p36_p0 = scmp.ge.s32.totalorder %s34_s17, 2  ;;  %p109_p1 = scmp.ne.s32.totalorder %s567_s11, %s563_s10 }
   0x7   : > { %p110_p2 = scmp.eq.s32.totalorder %s407_s15, 1  ;;  %p115_p3 = scmp.ne.s32.totalorder %s563_s10, %s559_s9 }
   0x8   : > { %s732_s17 = smov (%p36_p0, %s34_s17), 0  ;;  %p116_p5 = scmp.eq.s32.totalorder %s408_s16, 1 }
   0x9   : > { %p640_p4 = por %p110_p2, %p109_p1  ;;  %s92_s20 = ssub.s32 %s575_s13, %s732_s17 }
   0xa   : > { %p412_p6 = scmp.ge.s32.totalorder %s579_s14, 1  ;;  %p97_p7 = scmp.eq.s32.totalorder %s92_s20, 0 }
   0xb   : > { %p647_p8 = por %p116_p5, %p115_p3  ;;  %p154_p9 = scmp.lt.s32.totalorder %s579_s14, 3 }
   0xc   : > { %s653_s22 = scalar_select %p97_p7, %s567_s11, %s99_s18  }
   0xd   : > { %p155_p10 = pnand %p412_p6, %p154_p9 }
   0xe   : > { %v201_v0 = vld [vmem:[%s722_s1] sm:$0xff] (!%p155_p10)  ;;  %v202_v1 = vld [vmem:[%s722_s1 + $0x8] sm:$0xf] (!%p155_p10)  ;;  %vm210_vm0 = vcmask (!%p155_p10), 1043456   ;;  %p185_p11 = scmp.lt.s32.totalorder (!%p155_p10), %s571_s12, 1  ;;  %vm581_vm1 = vmmov (!%p155_p10), 1  }
   0xf   : > { %158 = sbr.rel (%p155_p10) target bundleno = 256 (0x100), region = 28  ;;  %v437_v2 = vpack.c.bf16 (!%p155_p10), %v202_v1, %v201_v0  ;;  %vm438_vm2 = vmpackc.low (!%p155_p10), %vm210_vm0, %vm581_vm1  ;;  %vm203_vm3 = vcmask (!%p155_p10), 97280   ;;  %s181_s4 = sand.u32 (!%p155_p10), 1, %s563_s10   ;;  %vm289_vm4 = vcmask (!%p155_p10), 261120  }
  0x10   : > { %s413_s5 = sshll.u32 (!%p155_p10), %s181_s4, 4  ;;  %s425_s8 = sshll.u32 (!%p155_p10), %s571_s12, 8 }
  0x11   : > { %439 = vmatprep.subr.msk.bf16.mxu0 (!%p155_p10), %vm438_vm2, %v437_v2  ;;  %s183_s6 = scalar_lea.vmem (!%p155_p10), [#allocation2], %s413_s5  ;;  %s673_s18 = scalar_lea.hbm (!%p155_p10), %s723_s2, %s425_s8 }
  0x12   : > { %442 = vmatpush3.bf16.msk.msra.mxu0 (!%p155_p10), %vm438_vm2, %v437_v2  ;;  %s309_s7 = sshll.u32 (!%p155_p10), %s183_s6, 4  ;;  %s675_s20 = scalar_lea.sflag (!%p155_p10), [#allocation3], %s181_s4  ;;  %s668_s7 = int_to_ptr.vmem [resolvable:$true] %s309_s7 }
  0x13   : > { %s501_s23 = scalar_lea.vmem (!%p155_p10), %s668_s7, 256 }
  0x14   : > { %p502_p12 = scmp.ne.s32.totalorder (!%p155_p10), %s668_s7, %s501_s23 }
  0x16   : > { %s186_s27 = scalar_select %p185_p11, %s571_s12, 1 }
  0x17   : > { %p503_p13 = pnand %p502_p12, %p640_p4  ;;  %s582_s12 = smov [#allocation2]  }
  0x18   : > { %s424_s28 = sshll.u32 %s186_s27, 4  ;;  %s505_s24 = sshll.u32 %s582_s12, 4  ;;  %s506_s24 = int_to_ptr.vmem [resolvable:$false] %s505_s24 }
  0x19   : > { %s192_s3 = scalar_lea.vmem %s721_s0, %s424_s28  ;;  %p504_p0 = pneg %p503_p13 }
  0x1a   : > { %v199_v3 = vld [vmem:[%s192_s3] sm:$0xff]  ;;  %v200_v4 = vld [vmem:[%s192_s3 + $0x8] sm:$0xff]  ;;  %s507_s25 = scalar_lea.vmem %s506_s24, 512  ;;  %p508_p1 = scmp.lt.s32.totalorder %s668_s7, %s506_s24 }
  0x1b   : > { %434 = vmatprep.mubr.msk.f32.mxu0 %vm203_vm3, %v199_v3  ;;  %p509_p2 = scmp.lt.s32.totalorder %s507_s25, %s501_s23 }
  0x1c   : > { %435 = vmatmul.mubr.msk.f32.vlgmr.msra.gmra.mrb[0].mxu0 %vm203_vm3, %v200_v4 }
  0x1d   : > { %p510_p3 = por %p509_p2, %p508_p1 }
  0x1f   : > { %p511_p5 = pnand %p510_p3, %p504_p0 }
  0xef   : > { %v436_v5 = vpop.f32.mrb[0].mxu0 }
  0xf0   : > { %291 = vst.msk [vmem:[%s183_s6 + $0x8] sm:$0xff] %vm289_vm4, %v436_v5  ;;  %v280_v6 = vpop.f32.mrb[1].mxu0 }
  0xf1   : > { %290 = vst.msk [vmem:[%s183_s6] sm:$0xff] %vm289_vm4, %v280_v6 }
  0xf2   : > { %514 = shalt.err (!%p511_p5)
}
  0xf3   : > { %s515_s26 = scalar_lea.hbm %s673_s18, 256  ;;  %s519_s29 = scalar_lea.hbm %s723_s2, 512 }
  0xf4   : > { %p516_p6 = scmp.ne.s32.totalorder %s673_s18, %s515_s26  ;;  %p520_p10 = scmp.lt.u32.totalorder %s673_s18, %s723_s2 }
  0xf5   : > { %p521_p11 = scmp.lt.u32.totalorder %s519_s29, %s515_s26  ;;  %p523_p13 = scmp.lt.u32.totalorder %s515_s26, %s673_s18 }
  0xf6   : > { %p517_p7 = pnand %p516_p6, %p640_p4 }
  0xf7   : > { %p522_p12 = por %p521_p11, %p520_p10 }
  0xf8   : > { %p518_p9 = pneg %p517_p7 }
  0xf9   : > { %p524_p0 = por %p523_p13, %p522_p12 }
  0xfb   : > { %p525_p1 = pnand %p524_p0, %p518_p9 }
  0xfd   : > { %528 = shalt.err (!%p525_p1)
}
  0xfe   : > { %s583_s4 = smov 128   ;;  %s584_s5 = smov 8  }
  0xff   : > { %443 = dma.vmem_to_hbm [thread:$0]  (%p640_p4), %s668_s7, 256, %s673_s18, %s675_s20, %s583_s4, %s583_s4, %s584_s5  }
 0x100 PF: > { %p449_p2 = scmp.ge.s32.totalorder %s579_s14, 2  ;;  %s324_s6 = sand.u32 1, %s559_s9  }
 0x101   : > { %s325_s8 = scalar_lea.sflag [#allocation3], %s324_s6 }
 0x102   : > { %p446_p3 = pnand %p449_p2, %p647_p8 }
 0x104   : > { %554 = dma.done.wait (!%p446_p3), %s325_s8, 256  }
 0x105   : > { %556 = vsyncadd (!%p446_p3), %s325_s8, 4294967040  ;;  %s15_s14 = sadd.s32 1, %s579_s14   ;;  %s726_s9 = smov %s563_s10 }
 0x106   : > { %p12_p5 = scmp.ge.s32.totalorder %s15_s14, 4   ;;  %s727_s10 = smov %s567_s11 }
 0x107   : > { %s728_s11 = smov %s653_s22  ;;  %s729_s12 = smov %s575_s13 }
 0x108   : > { %s730_s13 = smov %s732_s17  ;;  %14 = sbr.rel (!%p12_p5) target bundleno = 4 (0x4), region = 66 }
 0x10f   :  { %330 = vsyncpa [#allocation3], 1 }
 0x110   :  { %332 = vsyncpa [#allocation3 + $0x1], 1 }

</bundles_post_ra>
